<compile_context>
chip_gen: v5e
topology: v5e:2x2
jax: 0.10.0
libtpu: 0.0.40
codegen_flags: <defaults>
</compile_context>

<pallas_src>
import functools

import jax
import jax.numpy as jnp
from jax.experimental import pallas as pl
from jax.experimental.pallas import tpu as pltpu

_LANE = 128
_SUBLANE = 8
_MAX_BLOCK_BYTES = 4 * 1024 * 1024       # ~4 MiB row tiles on the tiled path
_SMALL_BYTES = 4 * 1024 * 1024           # fully-VMEM-resident fused path threshold
_VMEM_LIMIT = 32 * 1024 * 1024           # explicit scoped-VMEM budget (safe on v5e..v7x)


# ----------------------------- kernels ------------------------------------- #

def _fused_resident_kernel(rm_ref, n_ref, x_ref, out_ref, new_rm_ref, new_n_ref,
                           *, inv_count):
    """Small-x path: sum + scalar update + scale in a single kernel invocation."""
    xv = x_ref[...].astype(jnp.float32)
    total = jnp.sum(xv, keepdims=True)                 # (1, 1)
    mean_x = total * inv_count                         # 1/true_count baked at trace time
    rm = rm_ref[0]
    n = n_ref[0]
    new_rm = rm + (mean_x - rm) / n                    # (1, 1)
    new_rm_ref[...] = new_rm
    new_n_ref[...] = (n + 1.0) * jnp.ones((1, 1), jnp.float32)
    inv = 1.0 / new_rm
    out_ref[...] = (xv * inv).astype(out_ref.dtype)


def _sum_update_kernel(rm_ref, n_ref, x_ref, new_rm_ref, new_n_ref, acc_ref,
                       *, inv_count):
    """Tiled global sum with the running-mean scalar update fused into the epilogue."""
    i = pl.program_id(0)

    @pl.when(i == 0)
    def _():
        acc_ref[...] = jnp.zeros_like(acc_ref)

    # Per-tile sublane reduce into a (1, 128) partial; cross-lane reduce only at the end.
    acc_ref[...] += jnp.sum(x_ref[...].astype(jnp.float32), axis=0, keepdims=True)

    @pl.when(i == pl.num_programs(0) - 1)
    def _():
        total = jnp.sum(acc_ref[...], axis=1, keepdims=True)   # (1, 1)
        mean_x = total * inv_count
        rm = rm_ref[0]
        n = n_ref[0]
        new_rm_ref[...] = rm + (mean_x - rm) / n
        new_n_ref[...] = (n + 1.0) * jnp.ones((1, 1), jnp.float32)


def _scale_kernel(denom_ref, x_ref, out_ref):
    """out = x * (1 / denom); denom is the (updated) running mean, held in SMEM."""
    inv = 1.0 / denom_ref[0]
    out_ref[...] = (x_ref[...].astype(jnp.float32) * inv).astype(out_ref.dtype)


# ----------------------------- layout / tiling ------------------------------ #

def _prep(x, max_block_bytes):
    """Flatten x to a lane-dense (rows, 128) slab; rows = tm * n_tiles with tm % 8 == 0.

    Zero-pads the tail (exact for the sum since we divide by the true count; padded
    output elements are sliced away by the caller).  Returns (x2d, true_count, tm, n_tiles).
    """
    n = x.size
    itemsize = jnp.dtype(x.dtype).itemsize
    rows_min = max(_SUBLANE, pl.cdiv(n, _LANE))
    cap = max(_SUBLANE, (max_block_bytes // (_LANE * itemsize)) // _SUBLANE * _SUBLANE)
    n_tiles = max(1, pl.cdiv(rows_min, cap))
    tm = pl.cdiv(rows_min, n_tiles)
    tm = pl.cdiv(tm, _SUBLANE) * _SUBLANE
    rows = tm * n_tiles
    flat = x.reshape(-1)
    if rows * _LANE != n:
        flat = jnp.pad(flat, (0, rows * _LANE - n))
    return flat.reshape(rows, _LANE), n, tm, n_tiles


# ----------------------------- pallas_call wrappers ------------------------- #

def _fused_call(rm, cnt, x2d, *, inv_count):
    rows, d = x2d.shape
    itemsize = jnp.dtype(x2d.dtype).itemsize
    kernel = functools.partial(_fused_resident_kernel, inv_count=inv_count)
    return pl.pallas_call(
        kernel,
        out_shape=(jax.ShapeDtypeStruct((rows, d), x2d.dtype),
                   jax.ShapeDtypeStruct((1, 1), jnp.float32),
                   jax.ShapeDtypeStruct((1, 1), jnp.float32)),
        grid=(1,),
        in_specs=[
            pl.BlockSpec(memory_space=pltpu.MemorySpace.SMEM),        # rm (1,)
            pl.BlockSpec(memory_space=pltpu.MemorySpace.SMEM),        # items_so_far (1,)
            pl.BlockSpec((rows, d), lambda i: (0, 0)),                # x, fully resident
        ],
        out_specs=(pl.BlockSpec((rows, d), lambda i: (0, 0)),
                   pl.BlockSpec((1, 1), lambda i: (0, 0)),
                   pl.BlockSpec((1, 1), lambda i: (0, 0))),
        compiler_params=pltpu.CompilerParams(
            dimension_semantics=("arbitrary",),
            vmem_limit_bytes=_VMEM_LIMIT),
        cost_estimate=pl.CostEstimate(
            flops=2 * rows * d, transcendentals=0,
            bytes_accessed=2 * rows * d * itemsize + 16),
    )(rm, cnt, x2d)


def _sum_update_call(rm, cnt, x2d, *, tm, n_tiles, inv_count):
    rows, d = x2d.shape
    itemsize = jnp.dtype(x2d.dtype).itemsize
    kernel = functools.partial(_sum_update_kernel, inv_count=inv_count)
    return pl.pallas_call(
        kernel,
        out_shape=(jax.ShapeDtypeStruct((1, 1), jnp.float32),
                   jax.ShapeDtypeStruct((1, 1), jnp.float32)),
        grid=(n_tiles,),
        in_specs=[
            pl.BlockSpec(memory_space=pltpu.MemorySpace.SMEM),        # rm (1,)
            pl.BlockSpec(memory_space=pltpu.MemorySpace.SMEM),        # items_so_far (1,)
            pl.BlockSpec((tm, d), lambda i: (i, 0)),                  # x row tile
        ],
        out_specs=(pl.BlockSpec((1, 1), lambda i: (0, 0)),
                   pl.BlockSpec((1, 1), lambda i: (0, 0))),
        scratch_shapes=[pltpu.VMEM((1, d), jnp.float32)],             # per-lane partial sums
        compiler_params=pltpu.CompilerParams(
            dimension_semantics=("arbitrary",),
            vmem_limit_bytes=_VMEM_LIMIT),
        cost_estimate=pl.CostEstimate(
            flops=rows * d, transcendentals=0,
            bytes_accessed=rows * d * itemsize + 16),
    )(rm, cnt, x2d)


def _scale_call(denom, x2d, *, tm, n_tiles):
    rows, d = x2d.shape
    itemsize = jnp.dtype(x2d.dtype).itemsize
    return pl.pallas_call(
        _scale_kernel,
        out_shape=jax.ShapeDtypeStruct((rows, d), x2d.dtype),
        grid=(n_tiles,),
        in_specs=[
            pl.BlockSpec(memory_space=pltpu.MemorySpace.SMEM),        # denom (1,)
            pl.BlockSpec((tm, d), lambda i: (i, 0)),                  # x row tile
        ],
        out_specs=pl.BlockSpec((tm, d), lambda i: (i, 0)),
        compiler_params=pltpu.CompilerParams(
            dimension_semantics=("parallel",),
            vmem_limit_bytes=_VMEM_LIMIT),
        cost_estimate=pl.CostEstimate(
            flops=rows * d, transcendentals=0,
            bytes_accessed=2 * rows * d * itemsize),
    )(denom, x2d)


# ----------------------------- public entry point --------------------------- #

def running_mean_scaler(x, running_mean, items_so_far, *, training=True,
                        max_block_bytes=_MAX_BLOCK_BYTES, small_bytes=_SMALL_BYTES):
    """Functional equivalent of _RunningMeanScaler.forward.

    Returns (scaled_x, new_running_mean, new_items_so_far).
    """
    orig_shape = x.shape
    x2d, n_true, tm, n_tiles = _prep(x, max_block_bytes)
    rows, d = x2d.shape
    itemsize = jnp.dtype(x2d.dtype).itemsize

    rm = running_mean.astype(jnp.float32).reshape(1)
    cnt = items_so_far.astype(jnp.float32).reshape(1)
    inv_count = 1.0 / float(n_true)

    if training:
        if rows * d * itemsize <= small_bytes:
            # One fused, fully-VMEM-resident kernel: sum + update + scale.
            out2d, new_rm11, new_n11 = _fused_call(rm, cnt, x2d, inv_count=inv_count)
        else:
            # Tiled two-pass path: fused sum+update, then broadcast scale.
            new_rm11, new_n11 = _sum_update_call(rm, cnt, x2d, tm=tm, n_tiles=n_tiles,
                                                 inv_count=inv_count)
            out2d = _scale_call(new_rm11.reshape(1), x2d, tm=tm, n_tiles=n_tiles)
        new_rm = new_rm11.reshape(1)
        new_n = new_n11.reshape(1)
    else:
        new_rm, new_n = rm, cnt
        out2d = _scale_call(rm, x2d, tm=tm, n_tiles=n_tiles)

    flat = out2d.reshape(-1)
    if flat.size != n_true:
        flat = flat[:n_true]
    out = flat.reshape(orig_shape)

    # TODO(synk): the PyTorch module mutates its nn.Buffers in place; here the updated
    # buffers are returned functionally for the caller to carry.
    return out, new_rm.astype(running_mean.dtype), new_n.astype(items_so_far.dtype)


# ----------------------------- reference & test ----------------------------- #

def _ref_forward(x, rm, n, training=True):
    """Pure-JAX reference mirroring the PyTorch module exactly."""
    rm = rm.astype(jnp.float32)
    n = n.astype(jnp.float32)
    if training:
        new_rm = jnp.mean(rm + (x.astype(jnp.float32) - rm) / n).reshape(1)
        new_n = n + 1.0
    else:
        new_rm, new_n = rm, n
    return (x / new_rm).astype(x.dtype), new_rm, new_n


def _check(got, ref, rtol=1e-5, atol=1e-5):
    assert jnp.allclose(got, ref, rtol=rtol, atol=atol), (got, ref)


if __name__ == "__main__":
    key = jax.random.PRNGKey(0)
    k1, k2, k3 = jax.random.split(key, 3)

    # Buffer init as in __init__: ones.
    rm0 = jnp.ones((1,), dtype=jnp.float32)
    n0 = jnp.ones((1,), dtype=jnp.float32)

    # --- 1) small lane-aligned input: fused resident path, training then eval ---
    x = jax.random.normal(k1, (8, 128), dtype=jnp.float32) + 2.0
    y, rm1, n1 = running_mean_scaler(x, rm0, n0, training=True)
    jax.block_until_ready((y, rm1, n1))
    y_ref, rm1_ref, n1_ref = _ref_forward(x, rm0, n0, training=True)
    _check(y, y_ref); _check(rm1, rm1_ref, atol=1e-6); _check(n1, n1_ref)

    y2, rm2, n2 = running_mean_scaler(x, rm1, n1, training=False)
    jax.block_until_ready((y2, rm2, n2))
    y2_ref, _, _ = _ref_forward(x, rm1, n1, training=False)
    _check(y2, y2_ref)
    assert jnp.allclose(rm2, rm1) and jnp.allclose(n2, n1)

    # --- 2) odd / non-aligned shape: exercises flatten + zero-padding path ---
    xo = jax.random.normal(k2, (5, 37), dtype=jnp.float32) + 2.0
    yo, rmo, no_ = running_mean_scaler(xo, rm1, n1, training=True)
    jax.block_until_ready((yo, rmo, no_))
    yo_ref, rmo_ref, no_ref = _ref_forward(xo, rm1, n1, training=True)
    _check(yo, yo_ref); _check(rmo, rmo_ref, atol=1e-6); _check(no_, no_ref)

    # --- 3) force the tiled multi-block path on a small array (tm=8, 8 tiles) ---
    xt = jax.random.normal(k3, (64, 128), dtype=jnp.float32) + 2.0
    yt, rmt, nt = running_mean_scaler(xt, rm0, n0, training=True,
                                      max_block_bytes=8 * 128 * 4, small_bytes=0)
    jax.block_until_ready((yt, rmt, nt))
    yt_ref, rmt_ref, nt_ref = _ref_forward(xt, rm0, n0, training=True)
    _check(yt, yt_ref); _check(rmt, rmt_ref, atol=1e-6); _check(nt, nt_ref)

    yt2, _, _ = running_mean_scaler(xt, rmt, nt, training=False,
                                    max_block_bytes=8 * 128 * 4, small_bytes=0)
    jax.block_until_ready(yt2)
    yt2_ref, _, _ = _ref_forward(xt, rmt, nt, training=False)
    _check(yt2, yt2_ref)

    print("KERNEL_OK")
</pallas_src>

<mosaic_0001>
module attributes {stable_mosaic.version = 11 : i64} {
  func.func @_fused_resident_kernel(%arg0: i32, %arg1: memref<1xf32, #tpu.memory_space<smem>>, %arg2: memref<1xf32, #tpu.memory_space<smem>>, %arg3: memref<8x128xf32, #tpu.memory_space<vmem>>, %arg4: memref<8x128xf32, #tpu.memory_space<vmem>>, %arg5: memref<1x1xf32, #tpu.memory_space<vmem>>, %arg6: memref<1x1xf32, #tpu.memory_space<vmem>>) attributes {dimension_semantics = [#tpu.dimension_semantics<arbitrary>], iteration_bounds = array<i64: 1>, scalar_prefetch = 0 : i64, scratch_operands = 0 : i64, tpu.core_type = #tpu.core_type<tc>, window_params = [{transform_indices = @transform_0, window_bounds = array<i64: 1>}, {transform_indices = @transform_1, window_bounds = array<i64: 1>}, {pipeline_mode = #tpu.pipeline_mode<synchronous>, transform_indices = @transform_2, window_bounds = array<i64: 8, 128>}, {pipeline_mode = #tpu.pipeline_mode<synchronous>, transform_indices = @transform_3, window_bounds = array<i64: 8, 128>}, {pipeline_mode = #tpu.pipeline_mode<synchronous>, transform_indices = @transform_4, window_bounds = array<i64: 1, 1>}, {pipeline_mode = #tpu.pipeline_mode<synchronous>, transform_indices = @transform_5, window_bounds = array<i64: 1, 1>}]} {
    %c0 = arith.constant 0 : index
    %c0_0 = arith.constant 0 : index
    %0 = vector.load %arg3[%c0, %c0_0] : memref<8x128xf32, #tpu.memory_space<vmem>>, vector<8x128xf32>
    %1 = vector.shape_cast %0 : vector<8x128xf32> to vector<1x8x128xf32>
    %cst = arith.constant dense<0.000000e+00> : vector<1xf32>
    %2 = vector.multi_reduction <add>, %1, %cst [1, 2] : vector<1x8x128xf32> to vector<1xf32>
    %3 = vector.shape_cast %2 : vector<1xf32> to vector<1x1x1xf32>
    %4 = vector.extract %3[0, 0, 0] : f32 from vector<1x1x1xf32>
    %5 = vector.broadcast %4 : f32 to vector<1x1xf32>
    %cst_1 = arith.constant 9.765625E-4 : f32
    %6 = vector.broadcast %cst_1 : f32 to vector<1x1xf32>
    %7 = arith.mulf %5, %6 : vector<1x1xf32>
    %c0_2 = arith.constant 0 : index
    %8 = memref.load %arg1[%c0_2] : memref<1xf32, #tpu.memory_space<smem>>
    %c0_3 = arith.constant 0 : index
    %9 = memref.load %arg2[%c0_3] : memref<1xf32, #tpu.memory_space<smem>>
    %10 = vector.broadcast %8 : f32 to vector<1x1xf32>
    %11 = arith.subf %7, %10 : vector<1x1xf32>
    %12 = vector.broadcast %9 : f32 to vector<1x1xf32>
    %13 = arith.divf %11, %12 : vector<1x1xf32>
    %14 = vector.broadcast %8 : f32 to vector<1x1xf32>
    %15 = arith.addf %14, %13 : vector<1x1xf32>
    %c0_4 = arith.constant 0 : index
    %c0_5 = arith.constant 0 : index
    %16 = vector.load %arg5[%c0_4, %c0_5] : memref<1x1xf32, #tpu.memory_space<vmem>>, vector<1x1xf32>
    tpu.vector_store %arg5[%c0_4, %c0_5], %15 {strides = array<i32>} : memref<1x1xf32, #tpu.memory_space<vmem>>, vector<1x1xf32>,
    %cst_6 = arith.constant 1.000000e+00 : f32
    %17 = arith.addf %9, %cst_6 : f32
    %cst_7 = arith.constant 1.000000e+00 : f32
    %18 = vector.broadcast %cst_7 : f32 to vector<1x1xf32>
    %19 = vector.broadcast %17 : f32 to vector<1x1xf32>
    %20 = arith.mulf %19, %18 : vector<1x1xf32>
    %c0_8 = arith.constant 0 : index
    %c0_9 = arith.constant 0 : index
    %21 = vector.load %arg6[%c0_8, %c0_9] : memref<1x1xf32, #tpu.memory_space<vmem>>, vector<1x1xf32>
    tpu.vector_store %arg6[%c0_8, %c0_9], %20 {strides = array<i32>} : memref<1x1xf32, #tpu.memory_space<vmem>>, vector<1x1xf32>,
    %cst_10 = arith.constant 1.000000e+00 : f32
    %22 = vector.broadcast %cst_10 : f32 to vector<1x1xf32>
    %23 = arith.divf %22, %15 : vector<1x1xf32>
    %24 = vector.broadcast %23 : vector<1x1xf32> to vector<8x128xf32>
    %25 = arith.mulf %0, %24 : vector<8x128xf32>
    %c0_11 = arith.constant 0 : index
    %c0_12 = arith.constant 0 : index
    %26 = vector.load %arg4[%c0_11, %c0_12] : memref<8x128xf32, #tpu.memory_space<vmem>>, vector<8x128xf32>
    tpu.vector_store %arg4[%c0_11, %c0_12], %25 {strides = array<i32>} : memref<8x128xf32, #tpu.memory_space<vmem>>, vector<8x128xf32>,
    return
  }
  func.func @transform_0(%arg0: i32) -> i32 {
    %c0_i32 = arith.constant 0 : i32
    %c0_i32_0 = arith.constant 0 : i32
    return %c0_i32 : i32
  }
  func.func @transform_1(%arg0: i32) -> i32 {
    %c0_i32 = arith.constant 0 : i32
    %c0_i32_0 = arith.constant 0 : i32
    return %c0_i32 : i32
  }
  func.func @transform_2(%arg0: i32) -> (i32, i32) {
    %c0_i32 = arith.constant 0 : i32
    %c0_i32_0 = arith.constant 0 : i32
    %c0_i32_1 = arith.constant 0 : i32
    return %c0_i32, %c0_i32_0 : i32, i32
  }
  func.func @transform_3(%arg0: i32) -> (i32, i32) {
    %c0_i32 = arith.constant 0 : i32
    %c0_i32_0 = arith.constant 0 : i32
    %c0_i32_1 = arith.constant 0 : i32
    return %c0_i32, %c0_i32_0 : i32, i32
  }
  func.func @transform_4(%arg0: i32) -> (i32, i32) {
    %c0_i32 = arith.constant 0 : i32
    %c0_i32_0 = arith.constant 0 : i32
    %c0_i32_1 = arith.constant 0 : i32
    return %c0_i32, %c0_i32_0 : i32, i32
  }
  func.func @transform_5(%arg0: i32) -> (i32, i32) {
    %c0_i32 = arith.constant 0 : i32
    %c0_i32_0 = arith.constant 0 : i32
    %c0_i32_1 = arith.constant 0 : i32
    return %c0_i32, %c0_i32_0 : i32, i32
  }
}

</mosaic_0001>

<bundles_post_ra>
// kernel: tpu_custom_call.1
= control target key start
LH: loop header
LB: loop body
LE: loop exit
PB: predicated region body
PF: predicated region fallthrough
CT: control target
= control target key end

     0   :  { %13 = vsyncpa [#allocation5], 0  ;;  %s311_s0 = inlined_call_operand.<no memory space> [shape: f32[1], index: 0, kind: input, shape index: {}]   ;;  %s312_s1 = inlined_call_operand.<no memory space> [shape: f32[1], index: 1, kind: input, shape index: {}]   ;;  %s313_s2 = inlined_call_operand.hbm [shape: f32[8,128], index: 2, kind: input, shape index: {}]   ;;  %s314_s3 = inlined_call_operand.hbm [shape: f32[8,128], index: 3, kind: output, shape index: {0}]   ;;  %s315_s4 = inlined_call_operand.hbm [shape: f32[1,1], index: 4, kind: output, shape index: {1}]   ;;  %s316_s5 = inlined_call_operand.hbm [shape: f32[1,1], index: 5, kind: output, shape index: {2}]  }
   0x1   :  { %14 = vsyncpa [#allocation6], 0 }
   0x2   :  { %15 = vsyncpa [#allocation9], 0  ;;  %s25_s20 = sshll.u32 %s313_s2, 4  ;;  %s250_s21 = smov [#allocation4]   ;;  %s26_s20 = int_to_ptr.hbm [resolvable:$true] %s25_s20 }
   0x3   :  { %s27_s22 = sshll.u32 %s250_s21, 4  ;;  %s28_s22 = int_to_ptr.vmem [resolvable:$true] %s27_s22 }
   0x4   :  { %30 = dma.hbm_to_vmem [thread:$0]  %s26_s20, 128, %s28_s22, [#allocation5]  }
   0x5   :  { %244 = dma.done.wait [#allocation5], 128  }
   0x6   :  { %245 = vsyncadd [#allocation5], 4294967168  ;;  %v287_v0 = vld [vmem:[#allocation4] sm:$0xff]  ;;  %v51_v8 = vstv %s312_s1  ;;  %s70_s26 = sadd.f32 1.0, %s312_s1  ;;  %vm68_vm2 = vcmask 0   ;;  %v49_v20 = vstv %s311_s0  ;;  %s251_s1 = smov [#allocation8]  }
   0x7   :  { %36 = vadd.xlane.f32.xlu0 %v287_v0  ;;  %144 = vrcp.f32 %v51_v8  ;;  %vm57_vm0 = vweird.f32 %v51_v8  ;;  %v63_v13 = vand.u32 2147483648, %v51_v8  ;;  %v61_v15 = vand.u32 2147483647, %v51_v8  ;;  %s106_s30 = sshll.u32 %s251_s1, 4  ;;  %s108_s8 = sshll.u32 %s315_s4, 4  ;;  %s107_s30 = int_to_ptr.vmem [resolvable:$true] %s106_s30  ;;  %s109_s8 = int_to_ptr.hbm [resolvable:$true] %s108_s8 }
   0x8   :  { %v71_v16 = vstv %s70_s26  ;;  %s252_s9 = smov [#allocation10]   ;;  %s119_s13 = sshll.u32 %s316_s5, 4  ;;  %s120_s13 = int_to_ptr.hbm [resolvable:$true] %s119_s13 }
   0x9   :  { %72 = vst.msk [vmem:[#allocation10] sm:$0x1] %vm68_vm2, %v71_v16  ;;  %v64_v17 = vor.u32 1.1754944e-38, %v63_v13  ;;  %vm62_vm4 = vcmp.eq.f32.partialorder %v61_v15, 8.507059e+37  ;;  %s117_s10 = sshll.u32 %s252_s9, 4  ;;  %s253_s0 = smov [#allocation7]   ;;  %s118_s10 = int_to_ptr.vmem [resolvable:$true] %s117_s10 }
   0xa   :  { %s95_s4 = sshll.u32 %s253_s0, 4  ;;  %s97_s15 = sshll.u32 %s314_s3, 4  ;;  %s96_s4 = int_to_ptr.vmem [resolvable:$true] %s95_s4  ;;  %s98_s15 = int_to_ptr.hbm [resolvable:$true] %s97_s15 }
   0xd   :  { %v145_v9 = vpop.eup %144 }
   0xe   :  { %v53_v10 = vmul.f32 %v145_v9, %v51_v8  ;;  %vm58_vm1 = vweird.f32 %v145_v9 }
   0xf   :  { %vm59_vm3 = vmor %vm57_vm0, %vm58_vm1 }
  0x10   :  { %v54_v11 = vsub.f32 1.0, %v53_v10 }
  0x12   :  { %v55_v12 = vmul.f32 %v145_v9, %v54_v11 }
  0x14   :  { %v56_v14 = vadd.f32 %v145_v9, %v55_v12 }
  0x16   :  { %v60_v18 = vsel %vm59_vm3, %v145_v9, %v56_v14 }
  0x17   :  { %v65_v22 = vsel %vm62_vm4, %v64_v17, %v60_v18 }
  0x7a   :  { %v37_v1 = vpop.xlane.xlu0 %36 }
  0x7b   :  { %v38_v2 = vrot.slane %v37_v1, 4 }
  0x7d   :  { %v39_v3 = vadd.f32 %v38_v2, %v37_v1 }
  0x7f   :  { %v40_v4 = vrot.slane %v39_v3, 2 }
  0x81   :  { %v41_v5 = vadd.f32 %v40_v4, %v39_v3 }
  0x83   :  { %v42_v6 = vrot.slane %v41_v5, 1 }
  0x85   :  { %v43_v7 = vadd.f32 %v42_v6, %v41_v5 }
  0x87   :  { %138 = vpush %v43_v7 }
  0xb8   :  { %s139_s27 = spop %138 }
  0xb9   :  { %v45_v19 = vstv %s139_s27 }
  0xba   :  { %v46_v21 = vmul.f32 0.0009765625, %v45_v19 }
  0xbc   :  { %v50_v23 = vsub.f32 %v46_v21, %v49_v20 }
  0xbe   :  { %v66_v24 = vmul.f32 %v65_v22, %v50_v23 }
  0xc0   :  { %v67_v25 = vadd.f32 %v66_v24, %v49_v20 }
  0xc2   :  { %146 = vrcp.f32 %v67_v25  ;;  %69 = vst.msk [vmem:[#allocation8] sm:$0x1] %vm68_vm2, %v67_v25  ;;  %v84_v29 = vand.u32 2147483648, %v67_v25  ;;  %v82_v31 = vand.u32 2147483647, %v67_v25  ;;  %vm78_vm6 = vweird.f32 %v67_v25 }
  0xc3   :  { %111 = dma.vmem_to_hbm [thread:$0]  %s107_s30, 16, %s109_s8, [#allocation9]  }
  0xc4   :  { %122 = dma.vmem_to_hbm [thread:$0]  %s118_s10, 16, %s120_s13, [#allocation9]   ;;  %v85_v33 = vor.u32 1.1754944e-38, %v84_v29  ;;  %vm83_vm8 = vcmp.eq.f32.partialorder %v82_v31, 8.507059e+37 }
  0xc8   :  { %v147_v26 = vpop.eup %146 }
  0xc9   :  { %v74_v27 = vmul.f32 %v147_v26, %v67_v25  ;;  %vm79_vm5 = vweird.f32 %v147_v26 }
  0xca   :  { %vm80_vm7 = vmor %vm78_vm6, %vm79_vm5 }
  0xcb   :  { %v75_v28 = vsub.f32 1.0, %v74_v27 }
  0xcd   :  { %v76_v30 = vmul.f32 %v147_v26, %v75_v28 }
  0xcf   :  { %v77_v32 = vadd.f32 %v147_v26, %v76_v30 }
  0xd1   :  { %v81_v34 = vsel %vm80_vm7, %v147_v26, %v77_v32 }
  0xd2   :  { %v86_v35 = vsel %vm83_vm8, %v85_v33, %v81_v34 }
  0xd3   :  { %v88_v36 = vmul.f32 %v86_v35, %v287_v0 }
  0xd5   :  { %89 = vst [vmem:[#allocation7] sm:$0xff] %v88_v36 }
  0xd6   :  { %100 = dma.vmem_to_hbm [thread:$0]  %s96_s4, 128, %s98_s15, [#allocation6]  }
  0xd7   :  { %246 = dma.done.wait [#allocation6], 128  }
  0xd8   :  { %247 = vsyncadd [#allocation6], 4294967168 }
  0xd9   :  { %248 = dma.done.wait [#allocation9], 32  }
  0xda   :  { %249 = vsyncadd [#allocation9], 4294967264 }
  0xdb   :  { %135 = vsyncpa [#allocation5], 1 }
  0xdc   :  { %136 = vsyncpa [#allocation6], 1 }
  0xdd   :  { %137 = vsyncpa [#allocation9], 1 }

</bundles_post_ra>
